<compile_context>
chip_gen: v5e
topology: v5e:2x2
jax: 0.10.0
libtpu: 0.0.40
codegen_flags: <defaults>
</compile_context>

<pallas_src>
import jax
import jax.numpy as jnp
from jax.experimental import pallas as pl
from jax.experimental.pallas import tpu as pltpu


def _round_up(v, m):
    return ((v + m - 1) // m) * m


def _num_tensorcores():
    """Best-effort TensorCore count of the local chip (megacore-aware)."""
    try:
        kind = jax.devices()[0].device_kind.lower()
    except Exception:
        return 1
    # v3/v4 megacore and v7x expose 2 TensorCores per chip; v5e/v6e have 1.
    return 2 if any(t in kind for t in ("v3", "v4", "v7", "7x")) else 1


def timm_model_forward(x_nchw, params, *, batch_tile=None):
    """Forward pass equivalent of BaseTimmModel.forward(x) (NCHW input)."""
    wconv = params["wconv"]
    bconv = params["bconv"]
    wfc = params["wfc"]
    bfc = params["bfc"]
    KH, KW, Cin, Cf = wconv.shape
    NC = wfc.shape[1]

    # ---- wrapper-side layout work (XLA): NCHW -> NHWC, pad=1, im2col ------
    x = jnp.transpose(x_nchw, (0, 2, 3, 1)).astype(jnp.bfloat16)   # (B,Hs,Ws,Cin)
    ph, pw = (KH - 1) // 2, (KW - 1) // 2
    x = jnp.pad(x, ((0, 0), (ph, ph), (pw, pw), (0, 0)))
    B, Hp, Wp, _ = x.shape
    H, W = Hp - KH + 1, Wp - KW + 1
    HW = H * W
    K = KH * KW * Cin

    # Lane-dense padded sizes (full 128-lane vregs everywhere in the kernel).
    Kp = _round_up(K, 128)
    Cfp = _round_up(Cf, 128)
    NCp = _round_up(NC, 128)

    # im2col: (B, HW, K) patch slab, K zero-padded to Kp, flattened to rows.
    cols = []
    for kh in range(KH):
        for kw in range(KW):
            cols.append(x[:, kh:kh + H, kw:kw + W, :])
    patches = jnp.concatenate(cols, axis=-1).reshape(B, HW, K)
    patches = jnp.pad(patches, ((0, 0), (0, 0), (0, Kp - K)))
    patches = patches.reshape(B * HW, Kp)                          # bf16, lane-dense

    # Packed weights: conv in bf16 for the MXU, head in f32 with the pooling
    # normalization folded in.  Zero padding in K/Cf/NC contributes nothing.
    inv_hw = 1.0 / float(HW)
    wconv_p = jnp.pad(wconv.reshape(K, Cf),
                      ((0, Kp - K), (0, Cfp - Cf))).astype(jnp.bfloat16)
    bconv_p = jnp.pad(bconv, (0, Cfp - Cf)).reshape(1, Cfp).astype(jnp.float32)
    wfc_p = jnp.pad(wfc.astype(jnp.float32) * inv_hw,
                    ((0, Cfp - Cf), (0, NCp - NC)))
    bfc_p = jnp.pad(bfc, (0, NCp - NC)).reshape(1, NCp).astype(jnp.float32)

    # ---- batch-tile selection (grid collapse per generation) --------------
    ncores = _num_tensorcores()
    if batch_tile is not None and B % batch_tile == 0:
        TB = batch_tile
    elif ncores > 1 and B % ncores == 0:
        TB = B // ncores        # one batch tile per TensorCore (v7x megacore)
    elif ncores > 1:
        TB = 1                  # uneven batch: per-sample tiles
    else:
        TB = B                  # single-TC chip: one grid step, no loop overhead
    grid = (B // TB,)
    M = TB * HW                 # rows per grid step (multiple of 8 since HW=H*W)

    # Block-diagonal pooling selector: row b sums its own HW activation rows.
    row_batch = jnp.arange(M, dtype=jnp.int32) // HW
    sel = (row_batch[None, :] == jnp.arange(TB, dtype=jnp.int32)[:, None]
           ).astype(jnp.float32)                                   # (TB, M)

    def kernel(p_ref, wc_ref, bc_ref, sel_ref, wf_ref, bf_ref, out_ref):
        # Conv as ONE lane-dense MXU dot: (M, Kp) x (Kp, Cfp), f32 accumulate.
        conv = jnp.dot(p_ref[...], wc_ref[...],
                       preferred_element_type=jnp.float32)         # (M, Cfp)
        # Bias + ReLU on the VPU, full 128-lane tiles (unmasked).
        act = jnp.maximum(conv + bc_ref[...], 0.0)
        # Global average pool as a ones-matmul (MXU), 1/(H*W) folded into wf.
        feat = jnp.dot(sel_ref[...], act,
                       preferred_element_type=jnp.float32)          # (TB, Cfp)
        # Classifier head in f32 (no precision-losing bf16 cast of feat).
        logits = jnp.dot(feat, wf_ref[...],
                         preferred_element_type=jnp.float32) + bf_ref[...]
        out_ref[...] = logits.reshape(TB, 1, NCp).astype(out_ref.dtype)

    out = pl.pallas_call(
        kernel,
        out_shape=jax.ShapeDtypeStruct((B, 1, NCp), jnp.float32),
        grid_spec=pltpu.PrefetchScalarGridSpec(
            num_scalar_prefetch=0,
            grid=grid,
            in_specs=[
                pl.BlockSpec((M, Kp), lambda b: (b, 0)),      # im2col rows
                pl.BlockSpec((Kp, Cfp), lambda b: (0, 0)),    # conv weight
                pl.BlockSpec((1, Cfp), lambda b: (0, 0)),     # conv bias
                pl.BlockSpec((TB, M), lambda b: (0, 0)),      # pool selector
                pl.BlockSpec((Cfp, NCp), lambda b: (0, 0)),   # fc weight (pre-scaled)
                pl.BlockSpec((1, NCp), lambda b: (0, 0)),     # fc bias
            ],
            out_specs=pl.BlockSpec((TB, 1, NCp), lambda b: (b, 0, 0)),
        ),
        compiler_params=pltpu.CompilerParams(
            dimension_semantics=("parallel",),   # shards batch tiles across TCs
            vmem_limit_bytes=32 * 1024 * 1024,   # headroom under v7x's 64 MiB
        ),
    )(patches, wconv_p, bconv_p, sel, wfc_p, bfc_p)

    # Strip lane padding in the wrapper.
    return out.reshape(B, NCp)[:, :NC]


def init_params(key, cin=4, cf=32, kh=3, kw=3, num_classes=10):
    k1, k2, k3, k4 = jax.random.split(key, 4)
    return {
        "wconv": 0.1 * jax.random.normal(k1, (kh, kw, cin, cf), jnp.float32),
        "bconv": 0.1 * jax.random.normal(k2, (cf,), jnp.float32),
        "wfc":   0.1 * jax.random.normal(k3, (cf, num_classes), jnp.float32),
        "bfc":   0.1 * jax.random.normal(k4, (num_classes,), jnp.float32),
    }


def _reference_forward(x_nchw, params):
    """Plain-JAX f32 reference used only to sanity check the kernel."""
    x = jnp.transpose(x_nchw, (0, 2, 3, 1)).astype(jnp.float32)
    x = jnp.pad(x, ((0, 0), (1, 1), (1, 1), (0, 0)))
    B, Hp, Wp, Cin = x.shape
    KH, KW, _, Cf = params["wconv"].shape
    H, W = Hp - KH + 1, Wp - KW + 1
    acc = jnp.zeros((B, H, W, Cf), jnp.float32)
    for kh in range(KH):
        for kw in range(KW):
            acc = acc + jnp.einsum("bhwc,cf->bhwf",
                                   x[:, kh:kh + H, kw:kw + W, :],
                                   params["wconv"][kh, kw])
    acc = jnp.maximum(acc + params["bconv"], 0.0)
    feat = acc.reshape(B, H * W, Cf).mean(axis=1)
    return feat @ params["wfc"] + params["bfc"]


if __name__ == "__main__":
    key = jax.random.PRNGKey(0)
    kx, kp = jax.random.split(key)

    # Input mimicking the NCHW image batch the timm model receives.
    x = jax.random.normal(kx, (2, 4, 16, 16), jnp.float32)  # [B, C, H, W]
    params = init_params(kp, cin=4, cf=32, num_classes=10)

    logits = jax.block_until_ready(timm_model_forward(x, params))

    ref = _reference_forward(x, params)
    assert logits.shape == (2, 10)
    # Conv operands are bf16 on the MXU; pool + fc stay f32.
    assert jnp.allclose(logits, ref, rtol=2e-2, atol=2e-2), float(
        jnp.max(jnp.abs(logits - ref)))

    print("KERNEL_OK")
</pallas_src>

<mosaic_0001>
module attributes {stable_mosaic.version = 11 : i64} {
  func.func @kernel(%arg0: i32, %arg1: memref<512x128xbf16, #tpu.memory_space<vmem>>, %arg2: memref<128x128xbf16, #tpu.memory_space<vmem>>, %arg3: memref<1x128xf32, #tpu.memory_space<vmem>>, %arg4: memref<2x512xf32, #tpu.memory_space<vmem>>, %arg5: memref<128x128xf32, #tpu.memory_space<vmem>>, %arg6: memref<1x128xf32, #tpu.memory_space<vmem>>, %arg7: memref<2x1x128xf32, #tpu.memory_space<vmem>>) attributes {dimension_semantics = [#tpu.dimension_semantics<parallel>], iteration_bounds = array<i64: 1>, scalar_prefetch = 0 : i64, scratch_operands = 0 : i64, tpu.core_type = #tpu.core_type<tc>, window_params = [{transform_indices = @transform_0, window_bounds = array<i64: 512, 128>}, {pipeline_mode = #tpu.pipeline_mode<synchronous>, transform_indices = @transform_1, window_bounds = array<i64: 128, 128>}, {pipeline_mode = #tpu.pipeline_mode<synchronous>, transform_indices = @transform_2, window_bounds = array<i64: 1, 128>}, {pipeline_mode = #tpu.pipeline_mode<synchronous>, transform_indices = @transform_3, window_bounds = array<i64: 2, 512>}, {pipeline_mode = #tpu.pipeline_mode<synchronous>, transform_indices = @transform_4, window_bounds = array<i64: 128, 128>}, {pipeline_mode = #tpu.pipeline_mode<synchronous>, transform_indices = @transform_5, window_bounds = array<i64: 1, 128>}, {transform_indices = @transform_6, window_bounds = array<i64: 2, 1, 128>}]} {
    %c0 = arith.constant 0 : index
    %c0_0 = arith.constant 0 : index
    %0 = vector.load %arg1[%c0, %c0_0] : memref<512x128xbf16, #tpu.memory_space<vmem>>, vector<512x128xbf16>
    %c0_1 = arith.constant 0 : index
    %c0_2 = arith.constant 0 : index
    %1 = vector.load %arg2[%c0_1, %c0_2] : memref<128x128xbf16, #tpu.memory_space<vmem>>, vector<128x128xbf16>
    %cst = arith.constant dense<0.000000e+00> : vector<512x128xf32>
    %2 = tpu.matmul %0, %1, %cst {dimension_numbers = #tpu.dot_dimension_numbers<[1], [0], [0], [1], [0, 0, 1, 1], [], []>} : vector<512x128xbf16>, vector<128x128xbf16>, vector<512x128xf32> -> vector<512x128xf32>
    %c0_3 = arith.constant 0 : index
    %c0_4 = arith.constant 0 : index
    %3 = vector.load %arg3[%c0_3, %c0_4] : memref<1x128xf32, #tpu.memory_space<vmem>>, vector<1x128xf32>
    %4 = vector.broadcast %3 : vector<1x128xf32> to vector<512x128xf32>
    %5 = arith.addf %2, %4 : vector<512x128xf32>
    %cst_5 = arith.constant 0.000000e+00 : f32
    %6 = vector.broadcast %cst_5 : f32 to vector<512x128xf32>
    %7 = arith.maximumf %5, %6 : vector<512x128xf32>
    %c0_6 = arith.constant 0 : index
    %c0_7 = arith.constant 0 : index
    %8 = vector.load %arg4[%c0_6, %c0_7] : memref<2x512xf32, #tpu.memory_space<vmem>>, vector<2x512xf32>
    %cst_8 = arith.constant dense<0.000000e+00> : vector<2x128xf32>
    %9 = tpu.matmul %8, %7, %cst_8 {dimension_numbers = #tpu.dot_dimension_numbers<[1], [0], [0], [1], [0, 0, 1, 1], [], []>} : vector<2x512xf32>, vector<512x128xf32>, vector<2x128xf32> -> vector<2x128xf32>
    %c0_9 = arith.constant 0 : index
    %c0_10 = arith.constant 0 : index
    %10 = vector.load %arg5[%c0_9, %c0_10] : memref<128x128xf32, #tpu.memory_space<vmem>>, vector<128x128xf32>
    %cst_11 = arith.constant dense<0.000000e+00> : vector<2x128xf32>
    %11 = tpu.matmul %9, %10, %cst_11 {dimension_numbers = #tpu.dot_dimension_numbers<[1], [0], [0], [1], [0, 0, 1, 1], [], []>} : vector<2x128xf32>, vector<128x128xf32>, vector<2x128xf32> -> vector<2x128xf32>
    %c0_12 = arith.constant 0 : index
    %c0_13 = arith.constant 0 : index
    %12 = vector.load %arg6[%c0_12, %c0_13] : memref<1x128xf32, #tpu.memory_space<vmem>>, vector<1x128xf32>
    %13 = vector.broadcast %12 : vector<1x128xf32> to vector<2x128xf32>
    %14 = arith.addf %11, %13 : vector<2x128xf32>
    %15 = vector.shape_cast %14 : vector<2x128xf32> to vector<2x1x128xf32>
    %c0_14 = arith.constant 0 : index
    %c0_15 = arith.constant 0 : index
    %c0_16 = arith.constant 0 : index
    %16 = vector.load %arg7[%c0_14, %c0_15, %c0_16] : memref<2x1x128xf32, #tpu.memory_space<vmem>>, vector<2x1x128xf32>
    tpu.vector_store %arg7[%c0_14, %c0_15, %c0_16], %15 {strides = array<i32>} : memref<2x1x128xf32, #tpu.memory_space<vmem>>, vector<2x1x128xf32>,
    return
  }
  func.func @transform_0(%arg0: i32) -> (i32, i32) {
    %c0_i32 = arith.constant 0 : i32
    %c0_i32_0 = arith.constant 0 : i32
    return %arg0, %c0_i32 : i32, i32
  }
  func.func @transform_1(%arg0: i32) -> (i32, i32) {
    %c0_i32 = arith.constant 0 : i32
    %c0_i32_0 = arith.constant 0 : i32
    %c0_i32_1 = arith.constant 0 : i32
    return %c0_i32, %c0_i32_0 : i32, i32
  }
  func.func @transform_2(%arg0: i32) -> (i32, i32) {
    %c0_i32 = arith.constant 0 : i32
    %c0_i32_0 = arith.constant 0 : i32
    %c0_i32_1 = arith.constant 0 : i32
    return %c0_i32, %c0_i32_0 : i32, i32
  }
  func.func @transform_3(%arg0: i32) -> (i32, i32) {
    %c0_i32 = arith.constant 0 : i32
    %c0_i32_0 = arith.constant 0 : i32
    %c0_i32_1 = arith.constant 0 : i32
    return %c0_i32, %c0_i32_0 : i32, i32
  }
  func.func @transform_4(%arg0: i32) -> (i32, i32) {
    %c0_i32 = arith.constant 0 : i32
    %c0_i32_0 = arith.constant 0 : i32
    %c0_i32_1 = arith.constant 0 : i32
    return %c0_i32, %c0_i32_0 : i32, i32
  }
  func.func @transform_5(%arg0: i32) -> (i32, i32) {
    %c0_i32 = arith.constant 0 : i32
    %c0_i32_0 = arith.constant 0 : i32
    %c0_i32_1 = arith.constant 0 : i32
    return %c0_i32, %c0_i32_0 : i32, i32
  }
  func.func @transform_6(%arg0: i32) -> (i32, i32, i32) {
    %c0_i32 = arith.constant 0 : i32
    %c0_i32_0 = arith.constant 0 : i32
    %c0_i32_1 = arith.constant 0 : i32
    return %arg0, %c0_i32, %c0_i32_0 : i32, i32, i32
  }
}

</mosaic_0001>

<bundles_post_ra>
// kernel: tpu_custom_call.1
= control target key start
LH: loop header
LB: loop body
LE: loop exit
PB: predicated region body
PF: predicated region fallthrough
CT: control target
= control target key end

     0   :  { %11 = vsyncpa [#allocation3], 0  ;;  %s1408_s0 = inlined_call_operand.hbm [shape: bf16[512,128], index: 0, kind: input, shape index: {}]   ;;  %s1409_s1 = inlined_call_operand.hbm [shape: bf16[128,128], index: 1, kind: input, shape index: {}]   ;;  %s1410_s2 = inlined_call_operand.vmem [shape: f32[1,128], index: 2, kind: input, shape index: {}]   ;;  %s1411_s3 = inlined_call_operand.hbm [shape: f32[2,512], index: 3, kind: input, shape index: {}]   ;;  %s1412_s4 = inlined_call_operand.hbm [shape: f32[128,128], index: 4, kind: input, shape index: {}]   ;;  %s1413_s5 = inlined_call_operand.vmem [shape: f32[1,128], index: 5, kind: input, shape index: {}]   ;;  %s1414_s6 = inlined_call_operand.hbm [shape: f32[2,1,128], index: 6, kind: output, shape index: {}]  }
   0x1   :  { %12 = vsyncpa [#allocation6], 0 }
   0x2   :  { %13 = vsyncpa [#allocation9], 0 }
   0x3   :  { %14 = vsyncpa [#allocation4], 0  ;;  %s32_s23 = sshll.u32 %s1409_s1, 4  ;;  %s1164_s24 = smov [#allocation5]   ;;  %s33_s23 = int_to_ptr.hbm [resolvable:$true] %s32_s23 }
   0x4   :  { %s34_s25 = sshll.u32 %s1164_s24, 4  ;;  %s19_s28 = sshll.u32 %s1408_s0, 4  ;;  %s35_s25 = int_to_ptr.vmem [resolvable:$true] %s34_s25  ;;  %s20_s28 = int_to_ptr.hbm [resolvable:$true] %s19_s28 }
   0x5   :  { %s1165_s29 = smov 64   ;;  %s1166_s30 = smov 4  }
   0x6   :  { %40 = dma.hbm_to_vmem [thread:$0]  %s33_s23, 1024, %s35_s25, [#allocation6], %s1165_s29, %s1165_s29, %s1166_s30  }
   0x7   :  { %s1167_s7 = smov [#allocation2]   ;;  %s48_s11 = sshll.u32 %s1411_s3, 4  ;;  %s49_s11 = int_to_ptr.hbm [resolvable:$true] %s48_s11 }
   0x8   :  { %s21_s8 = sshll.u32 %s1167_s7, 4  ;;  %s58_s13 = sshll.u32 %s1412_s4, 4  ;;  %s22_s8 = int_to_ptr.vmem [resolvable:$true] %s21_s8  ;;  %s59_s13 = int_to_ptr.hbm [resolvable:$true] %s58_s13 }
   0x9   :  { %27 = dma.hbm_to_vmem [thread:$0]  %s20_s28, 4096, %s22_s8, [#allocation3], %s1165_s29, %s1165_s29, %s1166_s30  }
   0xa   :  { %s1168_s14 = smov [#allocation7]   ;;  %s1169_s0 = smov [#allocation8]  }
   0xb   :  { %s50_s15 = sshll.u32 %s1168_s14, 4  ;;  %s60_s16 = sshll.u32 %s1169_s0, 4  ;;  %s51_s15 = int_to_ptr.vmem [resolvable:$true] %s50_s15  ;;  %s61_s16 = int_to_ptr.vmem [resolvable:$true] %s60_s16 }
   0xc   :  { %53 = dma.hbm_to_vmem [thread:$0]  %s49_s11, 128, %s51_s15, [#allocation6]  }
   0xd   :  { %s1170_s17 = smov 128   ;;  %s1171_s18 = smov 8  }
   0xe   :  { %66 = dma.hbm_to_vmem [thread:$0]  %s59_s13, 2048, %s61_s16, [#allocation9], %s1170_s17, %s1170_s17, %s1171_s18  }
   0xf   :  { %1156 = dma.done.wait [#allocation3], 4096  }
  0x10   :  { %1157 = vsyncadd [#allocation3], 4294963200 }
  0x11   :  { %1158 = dma.done.wait [#allocation6], 1152  }
  0x12   :  { %1159 = vsyncadd [#allocation6], 4294966144 }
  0x13   :  { %1160 = dma.done.wait [#allocation9], 2048  }
  0x14   :  { %1161 = vsyncadd [#allocation9], 4294965248  ;;  %v998_v0 = vld [vmem:[#allocation5 + $0x38] sm:$0xff]  ;;  %v997_v1 = vld [vmem:[#allocation5 + $0x30] sm:$0xff]  ;;  %s1172_s20 = smov [#allocation10]   ;;  %s784_s24 = sshll.u32 %s1414_s6, 4  ;;  %s785_s24 = int_to_ptr.hbm [resolvable:$true] %s784_s24 }
  0x15   :  { %409 = vmatpush.bf16.msra.mxu0 %v998_v0  ;;  %999 = vmatpush.bf16.msra.mxu1 %v998_v0  ;;  %v996_v2 = vld [vmem:[#allocation5 + $0x28] sm:$0xff]  ;;  %v995_v3 = vld [vmem:[#allocation5 + $0x20] sm:$0xff]  ;;  %v994_v4 = vld [vmem:[#allocation5 + $0x18] sm:$0xff]  ;;  %s782_s21 = sshll.u32 %s1172_s20, 4  ;;  %s1173_s25 = smov 16   ;;  %s783_s21 = int_to_ptr.vmem [resolvable:$true] %s782_s21 }
  0x16   :  { %1000 = vmatpush.bf16.msra.mxu2 %v998_v0  ;;  %1001 = vmatpush.bf16.msra.mxu3 %v998_v0  ;;  %v993_v5 = vld [vmem:[#allocation5 + $0x10] sm:$0xff]  ;;  %v992_v6 = vld [vmem:[#allocation5 + $0x8] sm:$0xff]  ;;  %v991_v7 = vld [vmem:[#allocation5] sm:$0xff]  ;;  %s1174_s26 = smov 1  }
  0x17   :  { %v959_v8 = vld [vmem:[#allocation2] sm:$0xff]  ;;  %v969_v9 = vld [vmem:[#allocation2 + $0x50] sm:$0xff]  ;;  %v976_v10 = vld [vmem:[#allocation2 + $0x88] sm:$0xff] }
  0x18   :  { %v982_v11 = vld [vmem:[#allocation2 + $0xb8] sm:$0xff]  ;;  %v960_v12 = vld [vmem:[#allocation2 + $0x8] sm:$0xff]  ;;  %v977_v14 = vld [vmem:[#allocation2 + $0x90] sm:$0xff] }
  0x19   :  { %410 = vmatpush.bf16.msra.mxu0 %v997_v1  ;;  %1002 = vmatpush.bf16.msra.mxu1 %v997_v1  ;;  %v970_v13 = vld [vmem:[#allocation2 + $0x58] sm:$0xff]  ;;  %v983_v15 = vld [vmem:[#allocation2 + $0xc0] sm:$0xff]  ;;  %v961_v16 = vld [vmem:[#allocation2 + $0x10] sm:$0xff] }
  0x1a   :  { %1003 = vmatpush.bf16.msra.mxu2 %v997_v1  ;;  %1004 = vmatpush.bf16.msra.mxu3 %v997_v1  ;;  %v971_v17 = vld [vmem:[#allocation2 + $0x60] sm:$0xff]  ;;  %v978_v18 = vld [vmem:[#allocation2 + $0x98] sm:$0xff]  ;;  %v984_v19 = vld [vmem:[#allocation2 + $0xc8] sm:$0xff] }
  0x1b   :  { %v962_v20 = vld [vmem:[#allocation2 + $0x18] sm:$0xff]  ;;  %v972_v21 = vld [vmem:[#allocation2 + $0x68] sm:$0xff]  ;;  %v979_v22 = vld [vmem:[#allocation2 + $0xa0] sm:$0xff] }
  0x1c   :  { %v985_v23 = vld [vmem:[#allocation2 + $0xd0] sm:$0xff]  ;;  %v963_v24 = vld [vmem:[#allocation2 + $0x20] sm:$0xff]  ;;  %v980_v26 = vld [vmem:[#allocation2 + $0xa8] sm:$0xff] }
  0x1d   :  { %411 = vmatpush.bf16.msra.mxu0 %v996_v2  ;;  %1005 = vmatpush.bf16.msra.mxu1 %v996_v2  ;;  %v973_v25 = vld [vmem:[#allocation2 + $0x70] sm:$0xff]  ;;  %v986_v27 = vld [vmem:[#allocation2 + $0xd8] sm:$0xff]  ;;  %v964_v28 = vld [vmem:[#allocation2 + $0x28] sm:$0xff] }
  0x1e   :  { %1006 = vmatpush.bf16.msra.mxu2 %v996_v2  ;;  %1007 = vmatpush.bf16.msra.mxu3 %v996_v2  ;;  %v974_v29 = vld [vmem:[#allocation2 + $0x78] sm:$0xff]  ;;  %v981_v30 = vld [vmem:[#allocation2 + $0xb0] sm:$0xff]  ;;  %v987_v31 = vld [vmem:[#allocation2 + $0xe0] sm:$0xff] }
  0x1f   :  { %v965_v32 = vld [vmem:[#allocation2 + $0x30] sm:$0xff]  ;;  %v988_v33 = vld [vmem:[#allocation2 + $0xe8] sm:$0xff]  ;;  %v966_v34 = vld [vmem:[#allocation2 + $0x38] sm:$0xff] }
  0x20   :  { %v989_v35 = vld [vmem:[#allocation2 + $0xf0] sm:$0xff]  ;;  %v975_v36 = vld [vmem:[#allocation2 + $0x80] sm:$0xff]  ;;  %v990_v40 = vld [vmem:[#allocation2 + $0xf8] sm:$0xff] }
  0x21   :  { %412 = vmatpush.bf16.msra.mxu0 %v995_v3  ;;  %1008 = vmatpush.bf16.msra.mxu1 %v995_v3  ;;  %v967_v37 = vld [vmem:[#allocation2 + $0x40] sm:$0xff]  ;;  %v1235_v45 = vld [vmem:[%s1410_s2] ss:$0 sm:$0xff]  ;;  %v968_v49 = vld [vmem:[#allocation2 + $0x48] sm:$0xff] }
  0x22   :  { %1009 = vmatpush.bf16.msra.mxu2 %v995_v3  ;;  %1010 = vmatpush.bf16.msra.mxu3 %v995_v3 }
  0x25   :  { %413 = vmatpush.bf16.msra.mxu0 %v994_v4  ;;  %1011 = vmatpush.bf16.msra.mxu1 %v994_v4 }
  0x26   :  { %1012 = vmatpush.bf16.msra.mxu2 %v994_v4  ;;  %1013 = vmatpush.bf16.msra.mxu3 %v994_v4 }
  0x29   :  { %414 = vmatpush.bf16.msra.mxu0 %v993_v5  ;;  %1014 = vmatpush.bf16.msra.mxu1 %v993_v5 }
  0x2a   :  { %1015 = vmatpush.bf16.msra.mxu2 %v993_v5  ;;  %1016 = vmatpush.bf16.msra.mxu3 %v993_v5 }
  0x2d   :  { %415 = vmatpush.bf16.msra.mxu0 %v992_v6  ;;  %1017 = vmatpush.bf16.msra.mxu1 %v992_v6 }
  0x2e   :  { %1018 = vmatpush.bf16.msra.mxu2 %v992_v6  ;;  %1019 = vmatpush.bf16.msra.mxu3 %v992_v6 }
  0x31   :  { %416 = vmatpush.bf16.msra.mxu0 %v991_v7  ;;  %1020 = vmatpush.bf16.msra.mxu1 %v991_v7 }
  0x32   :  { %1021 = vmatpush.bf16.msra.mxu2 %v991_v7  ;;  %1022 = vmatpush.bf16.msra.mxu3 %v991_v7 }
  0x34   :  { %417 = vmatmul.bf16.vlgmr.msra.gmra.mxu0 %v959_v8  ;;  %467 = vmatmul.bf16.vlgmr.msra.gmra.mxu1 %v969_v9 }
  0x35   :  { %502 = vmatmul.bf16.vlgmr.msra.gmra.mxu2 %v976_v10  ;;  %532 = vmatmul.bf16.vlgmr.msra.gmra.mxu3 %v982_v11 }
  0x44   :  { %422 = vmatmul.bf16.gmra.mxu0 %v960_v12  ;;  %472 = vmatmul.bf16.gmra.mxu1 %v970_v13 }
  0x45   :  { %507 = vmatmul.bf16.gmra.mxu2 %v977_v14  ;;  %537 = vmatmul.bf16.gmra.mxu3 %v983_v15 }
  0x54   :  { %427 = vmatmul.bf16.gmra.mxu0 %v961_v16  ;;  %477 = vmatmul.bf16.gmra.mxu1 %v971_v17 }
  0x55   :  { %512 = vmatmul.bf16.gmra.mxu2 %v978_v18  ;;  %542 = vmatmul.bf16.gmra.mxu3 %v984_v19 }
  0x64   :  { %432 = vmatmul.bf16.gmra.mxu0 %v962_v20  ;;  %482 = vmatmul.bf16.gmra.mxu1 %v972_v21 }
  0x65   :  { %517 = vmatmul.bf16.gmra.mxu2 %v979_v22  ;;  %547 = vmatmul.bf16.gmra.mxu3 %v985_v23 }
  0x74   :  { %437 = vmatmul.bf16.gmra.mxu0 %v963_v24  ;;  %487 = vmatmul.bf16.gmra.mxu1 %v973_v25 }
  0x75   :  { %522 = vmatmul.bf16.gmra.mxu2 %v980_v26  ;;  %552 = vmatmul.bf16.gmra.mxu3 %v986_v27 }
  0x84   :  { %442 = vmatmul.bf16.gmra.mxu0 %v964_v28  ;;  %492 = vmatmul.bf16.gmra.mxu1 %v974_v29 }
  0x85   :  { %527 = vmatmul.bf16.gmra.mxu2 %v981_v30  ;;  %557 = vmatmul.bf16.gmra.mxu3 %v987_v31 }
  0x94   :  { %447 = vmatmul.bf16.gmra.mxu0 %v965_v32  ;;  %497 = vmatmul.bf16.gmra.mxu1 %v975_v36 }
  0x95   :  { %562 = vmatmul.bf16.gmra.mxu3 %v988_v33 }
  0xa4   :  { %452 = vmatmul.bf16.gmra.mxu0 %v966_v34 }
  0xa5   :  { %567 = vmatmul.bf16.gmra.mxu3 %v989_v35 }
  0xb1   :  { %v1222_v38 = vpop.f32.mrf.mxu0  ;;  %v1224_v39 = vpop.f32.mrf.mxu1 }
  0xb4   :  { %457 = vmatmul.bf16.gmra.mxu0 %v967_v37 }
  0xb5   :  { %572 = vmatmul.bf16.gmra.mxu3 %v990_v40 }
  0xb8   :  { %v1226_v41 = vpop.f32.mrf.mxu2  ;;  %v533_v42 = vpop.f32.mrf.mxu3 }
  0xb9   :  { %v1228_v43 = vpop.f32.mrf.mxu0  ;;  %v1230_v44 = vpop.f32.mrf.mxu1  ;;  %v534_v46 = vadd.f32 %v1235_v45, %v533_v42 }
  0xbb   :  { %v624_v53 = vmax.f32 %v534_v46, 0.0 }
  0xc0   :  { %v1238_v47 = vpop.f32.mrf.mxu2  ;;  %v535_v48 = vpop.f32.mrf.mxu3 }
  0xc1   :  { %v1240_v50 = vpop.f32.mrf.mxu0  ;;  %v1242_v51 = vpop.f32.mrf.mxu1  ;;  %v536_v52 = vadd.f32 %v1235_v45, %v535_v48 }
  0xc3   :  { %v625_v54 = vmax.f32 %v536_v52, 0.0 }
  0xc4   :  { %462 = vmatmul.bf16.gmra.mxu0 %v968_v49 }
  0xc5   :  { %693 = vmatpush.msrb.mxu3 %v625_v54 }
  0xc7   :  { %694 = vmatpush.msrb.mxu3 %v624_v53 }
  0xc8   :  { %v1245_v55 = vpop.f32.mrf.mxu2  ;;  %v1247_v56 = vpop.f32.mrf.mxu3 }
  0xc9   :  { %v1249_v57 = vpop.f32.mrf.mxu0  ;;  %v1251_v58 = vpop.f32.mrf.mxu1 }
  0xd0   :  { %v1253_v59 = vpop.f32.mrf.mxu2  ;;  %v1255_v60 = vpop.f32.mrf.mxu3 }
  0xd1   :  { %v1257_v61 = vpop.f32.mrf.mxu0  ;;  %v478_v62 = vpop.f32.mrf.mxu1 }
  0xd8   :  { %v1259_v63 = vpop.f32.mrf.mxu2  ;;  %v1261_v0 = vpop.f32.mrf.mxu3 }
  0xd9   :  { %v1263_v1 = vpop.f32.mrf.mxu0  ;;  %v480_v2 = vpop.f32.mrf.mxu1 }
  0xe0   :  { %v1265_v3 = vpop.f32.mrf.mxu2  ;;  %v1267_v4 = vpop.f32.mrf.mxu3 }
  0xe1   :  { %v1269_v5 = vpop.f32.mrf.mxu0  ;;  %v483_v6 = vpop.f32.mrf.mxu1 }
  0xe2   :  { %v484_v36 = vadd.f32 %v1235_v45, %v483_v6 }
  0xe4   :  { %v604_v6 = vmax.f32 %v484_v36, 0.0 }
  0xe8   :  { %v518_v7 = vpop.f32.mrf.mxu2  ;;  %v1271_v8 = vpop.f32.mrf.mxu3 }
  0xe9   :  { %v1273_v9 = vpop.f32.mrf.mxu0  ;;  %v485_v10 = vpop.f32.mrf.mxu1 }
  0xea   :  { %v486_v33 = vadd.f32 %v1235_v45, %v485_v10 }
  0xec   :  { %v605_v52 = vmax.f32 %v486_v33, 0.0  ;;  %v469_v33 = vadd.f32 %v1235_v45, %v1224_v39  ;;  %v506_v39 = vadd.f32 %v1235_v45, %v1238_v47 }
  0xf0   :  { %v520_v11 = vpop.f32.mrf.mxu2  ;;  %v1275_v12 = vpop.f32.mrf.mxu3 }
  0xf1   :  { %v1277_v13 = vpop.f32.mrf.mxu0  ;;  %v488_v14 = vpop.f32.mrf.mxu1 }
  0xf2   :  { %v489_v30 = vadd.f32 %v1235_v45, %v488_v14  ;;  %v481_v14 = vadd.f32 %v1235_v45, %v480_v2 }
  0xf4   :  { %v606_v37 = vmax.f32 %v489_v30, 0.0 }
  0xf8   :  { %v523_v15 = vpop.f32.mrf.mxu2  ;;  %v1279_v16 = vpop.f32.mrf.mxu3 }
  0xf9   :  { %v1281_v17 = vpop.f32.mrf.mxu0  ;;  %v490_v18 = vpop.f32.mrf.mxu1  ;;  %v524_v53 = vadd.f32 %v1235_v45, %v523_v15  ;;  %v476_v15 = vadd.f32 %v1235_v45, %v1251_v58  ;;  %v471_v58 = vadd.f32 %v1235_v45, %v1230_v44  ;;  %v509_v44 = vadd.f32 %v1235_v45, %v1245_v55 }
  0xfa   :  { %v491_v28 = vadd.f32 %v1235_v45, %v490_v18  ;;  %v521_v18 = vadd.f32 %v1235_v45, %v520_v11  ;;  %v474_v11 = vadd.f32 %v1235_v45, %v1242_v51 }
  0xfc   :  { %v607_v34 = vmax.f32 %v491_v28, 0.0  ;;  %v619_v2 = vmax.f32 %v521_v18, 0.0  ;;  %v600_v51 = vmax.f32 %v474_v11, 0.0  ;;  %v441_v11 = vadd.f32 %v1235_v45, %v1281_v17 }
 0x100   :  { %v525_v19 = vpop.f32.mrf.mxu2  ;;  %v1283_v20 = vpop.f32.mrf.mxu3 }
 0x101   :  { %v1285_v21 = vpop.f32.mrf.mxu0  ;;  %v493_v22 = vpop.f32.mrf.mxu1  ;;  %v526_v46 = vadd.f32 %v1235_v45, %v525_v19  ;;  %v479_v19 = vadd.f32 %v1235_v45, %v478_v62  ;;  %v516_v62 = vadd.f32 %v1235_v45, %v1265_v3 }
 0x102   :  { %v494_v23 = vadd.f32 %v1235_v45, %v493_v22 }
 0x103   :  { %v621_v22 = vmax.f32 %v526_v46, 0.0  ;;  %v602_v30 = vmax.f32 %v479_v19, 0.0  ;;  %v617_v3 = vmax.f32 %v516_v62, 0.0 }
 0x104   :  { %v608_v31 = vmax.f32 %v494_v23, 0.0  ;;  %v519_v23 = vadd.f32 %v1235_v45, %v518_v7 }
 0x106   :  { %v618_v7 = vmax.f32 %v519_v23, 0.0 }
 0x108   :  { %v528_v24 = vpop.f32.mrf.mxu2  ;;  %v1288_v25 = vpop.f32.mrf.mxu3 }
 0x109   :  { %v1290_v26 = vpop.f32.mrf.mxu0  ;;  %v495_v27 = vpop.f32.mrf.mxu1  ;;  %v529_v35 = vadd.f32 %v1235_v45, %v528_v24  ;;  %v620_v24 = vmax.f32 %v524_v53, 0.0 }
 0x10a   :  { %v496_v29 = vadd.f32 %v1235_v45, %v495_v27  ;;  %v603_v27 = vmax.f32 %v481_v14, 0.0  ;;  %v446_v19 = vadd.f32 %v1235_v45, %v1290_v26  ;;  %v439_v26 = vadd.f32 %v1235_v45, %v1277_v13 }
 0x10b   :  { %v622_v54 = vmax.f32 %v529_v35, 0.0  ;;  %v599_v35 = vmax.f32 %v471_v58, 0.0 }
 0x10c   :  { %v609_v32 = vmax.f32 %v496_v29, 0.0 }
 0x10e   :  { %673 = vmatpush.msrb.mxu2 %v609_v32  ;;  %v514_v32 = vadd.f32 %v1235_v45, %v1259_v63 }
 0x110   :  { %v530_v40 = vpop.f32.mrf.mxu2  ;;  %674 = vmatpush.msrb.mxu2 %v608_v31  ;;  %v1298_v42 = vpop.f32.mrf.mxu3  ;;  %v601_v31 = vmax.f32 %v476_v15, 0.0 }
 0x111   :  { %v531_v48 = vadd.f32 %v1235_v45, %v530_v40  ;;  %v1302_v49 = vpop.f32.mrf.mxu0  ;;  %v598_v40 = vmax.f32 %v469_v33, 0.0  ;;  %v498_v47 = vpop.f32.mrf.mxu1 }
 0x112   :  { %675 = vmatpush.msrb.mxu2 %v607_v34  ;;  %v511_v34 = vadd.f32 %v1235_v45, %v1253_v59  ;;  %v504_v59 = vadd.f32 %v1235_v45, %v1226_v41  ;;  %v449_v41 = vadd.f32 %v1235_v45, %v1302_v49  ;;  %v589_v49 = vmax.f32 %v446_v19, 0.0 }
 0x113   :  { %v623_v10 = vmax.f32 %v531_v48, 0.0  ;;  %v614_v48 = vmax.f32 %v509_v44, 0.0 }
 0x114   :  { %676 = vmatpush.msrb.mxu2 %v606_v37  ;;  %v616_v37 = vmax.f32 %v514_v32, 0.0  ;;  %v615_v46 = vmax.f32 %v511_v34, 0.0  ;;  %v612_v55 = vmax.f32 %v504_v59, 0.0  ;;  %v587_v32 = vmax.f32 %v441_v11, 0.0 }
 0x115   :  { %695 = vmatpush.msrb.mxu3 %v623_v10  ;;  %v586_v34 = vmax.f32 %v439_v26, 0.0 }
 0x116   :  { %677 = vmatpush.msrb.mxu2 %v605_v52  ;;  %v613_v52 = vmax.f32 %v506_v39, 0.0  ;;  %v424_v39 = vadd.f32 %v1235_v45, %v1240_v50 }
 0x117   :  { %696 = vmatpush.msrb.mxu3 %v622_v54 }
 0x118   :  { %678 = vmatpush.msrb.mxu2 %v604_v6  ;;  %v1311_v28 = vpop.f32.mrf.mxu3 }
 0x119   :  { %697 = vmatpush.msrb.mxu3 %v621_v22  ;;  %v450_v29 = vpop.f32.mrf.mxu0  ;;  %v564_v11 = vadd.f32 %v1235_v45, %v1311_v28  ;;  %v556_v28 = vadd.f32 %v1235_v45, %v1283_v20  ;;  %v549_v20 = vadd.f32 %v1235_v45, %v1271_v8  ;;  %v541_v8 = vadd.f32 %v1235_v45, %v1255_v60  ;;  %v738_v60 = vld [vmem:[#allocation8 + $0x28] sm:$0xff] }
 0x11a   :  { %679 = vmatpush.msrb.mxu2 %v603_v27  ;;  %v451_v6 = vadd.f32 %v1235_v45, %v450_v29  ;;  %v444_v27 = vadd.f32 %v1235_v45, %v1285_v21  ;;  %v500_v29 = vpop.f32.mrf.mxu1  ;;  %v436_v21 = vadd.f32 %v1235_v45, %v1273_v9  ;;  %v429_v9 = vadd.f32 %v1235_v45, %v1257_v61 }
 0x11b   :  { %698 = vmatpush.msrb.mxu3 %v620_v24 }
 0x11c   :  { %680 = vmatpush.msrb.mxu2 %v602_v30  ;;  %v591_v23 = vmax.f32 %v451_v6, 0.0  ;;  %v501_v30 = vadd.f32 %v1235_v45, %v500_v29  ;;  %v588_v62 = vmax.f32 %v444_v27, 0.0 }
 0x11d   :  { %699 = vmatpush.msrb.mxu3 %v619_v2  ;;  %v590_v2 = vmax.f32 %v449_v41, 0.0 }
 0x11e   :  { %681 = vmatpush.msrb.mxu2 %v601_v31  ;;  %v611_v58 = vmax.f32 %v501_v30, 0.0  ;;  %v642_v31 = vld [vmem:[#allocation7] sm:$0xff] }
 0x11f   :  { %700 = vmatpush.msrb.mxu3 %v618_v7  ;;  %v499_v7 = vadd.f32 %v1235_v45, %v498_v47  ;;  %644 = vst [vmem:[#allocation1] ss:$4 sm:$0xff] %v642_v31 }
 0x120   :  { %682 = vmatpush.msrb.mxu2 %v600_v51  ;;  %v1325_v36 = vpop.f32.mrf.mxu3  ;;  %v434_v51 = vadd.f32 %v1235_v45, %v1269_v5 }
 0x121   :  { %701 = vmatpush.msrb.mxu3 %v617_v3  ;;  %v453_v63 = vpop.f32.mrf.mxu0  ;;  %v610_v17 = vmax.f32 %v499_v7, 0.0  ;;  %v431_v3 = vadd.f32 %v1235_v45, %v1263_v1  ;;  %v421_v1 = vadd.f32 %v1235_v45, %v1228_v43  ;;  %v636_v7 = vmax.f32 %v564_v11, 0.0 }
 0x122   :  { %683 = vmatpush.msrb.mxu2 %v599_v35  ;;  %v454_v10 = vadd.f32 %v1235_v45, %v453_v63  ;;  %v585_v35 = vmax.f32 %v436_v21, 0.0  ;;  %v584_v44 = vmax.f32 %v434_v51, 0.0  ;;  %v746_v21 = vld [vmem:[#allocation8 + $0x68] sm:$0xff]  ;;  %v744_v51 = vld [vmem:[#allocation8 + $0x58] sm:$0xff] }
 0x123   :  { %702 = vmatpush.msrb.mxu3 %v616_v37  ;;  %v426_v37 = vadd.f32 %v1235_v45, %v1249_v57  ;;  %v583_v63 = vmax.f32 %v431_v3, 0.0  ;;  %v580_v57 = vmax.f32 %v424_v39, 0.0  ;;  %v627_v39 = vmax.f32 %v541_v8, 0.0 }
 0x124   :  { %684 = vmatpush.msrb.mxu2 %v598_v40  ;;  %v592_v22 = vmax.f32 %v454_v10, 0.0 }
 0x125   :  { %703 = vmatpush.msrb.mxu3 %v615_v46  ;;  %v582_v46 = vmax.f32 %v429_v9, 0.0  ;;  %v581_v59 = vmax.f32 %v426_v37, 0.0  ;;  %v630_v9 = vmax.f32 %v549_v20, 0.0 }
 0x126   :  { %v647_v5 = vld.sshfl [vmem:[#allocation1 + $0x10] sm:$0xff pattern:$0x73625140]  ;;  %v646_v30 = vld.sshfl [vmem:[#allocation1 + $0x8] sm:$0xff pattern:$0x73625140] }
 0x127   :  { %704 = vmatpush.msrb.mxu3 %v614_v48  ;;  %v419_v48 = vadd.f32 %v1235_v45, %v1222_v38 }
 0x128   :  { %v1333_v53 = vpop.f32.mrf.mxu3 }
 0x129   :  { %705 = vmatpush.msrb.mxu3 %v613_v52  ;;  %v455_v54 = vpop.f32.mrf.mxu0  ;;  %v569_v19 = vadd.f32 %v1235_v45, %v1333_v53 }
 0x12a   :  { %v456_v14 = vadd.f32 %v1235_v45, %v455_v54 }
 0x12b   :  { %706 = vmatpush.msrb.mxu3 %v612_v55  ;;  %v579_v55 = vmax.f32 %v421_v1, 0.0  ;;  %v737_v1 = vld [vmem:[#allocation8 + $0x20] sm:$0xff] }
 0x12c   :  { %v593_v18 = vmax.f32 %v456_v14, 0.0  ;;  %v578_v14 = vmax.f32 %v419_v48, 0.0 }
 0x12d   :  { %707 = vmatpush.msrb.mxu3 %v611_v58  ;;  %v747_v58 = vld [vmem:[#allocation8 + $0x70] sm:$0xff] }
 0x12e   :  { %653 = vmatpush.msrb.mxu1 %v593_v18  ;;  %v645_v18 = vld.sshfl [vmem:[#allocation1] sm:$0xff pattern:$0x73625140] }
 0x12f   :  { %708 = vmatpush.msrb.mxu3 %v610_v17  ;;  %v745_v17 = vld [vmem:[#allocation8 + $0x60] sm:$0xff] }
 0x130   :  { %654 = vmatpush.msrb.mxu1 %v592_v22  ;;  %v570_v24 = vpop.f32.mrf.mxu3  ;;  %709 = vmatmul.f32.vlgmr.msrb.gmra.mxu3 %v647_v5 }
 0x131   :  { %v1342_v15 = vpop.f32.mrf.mxu0  ;;  %v571_v47 = vadd.f32 %v1235_v45, %v570_v24  ;;  %v566_v24 = vadd.f32 %v1235_v45, %v1325_v36  ;;  %v559_v36 = vadd.f32 %v1235_v45, %v1288_v25  ;;  %v551_v25 = vadd.f32 %v1235_v45, %v1275_v12 }
 0x132   :  { %655 = vmatpush.msrb.mxu1 %v591_v23  ;;  %v459_v27 = vadd.f32 %v1235_v45, %v1342_v15  ;;  %v561_v15 = vadd.f32 %v1235_v45, %v1298_v42  ;;  %v554_v42 = vadd.f32 %v1235_v45, %v1279_v16  ;;  %v546_v16 = vadd.f32 %v1235_v45, %v1267_v4 }
 0x133   :  { %v637_v26 = vmax.f32 %v566_v24, 0.0  ;;  %v631_v3 = vmax.f32 %v551_v25, 0.0  ;;  %v544_v12 = vadd.f32 %v1235_v45, %v1261_v0  ;;  %v539_v4 = vadd.f32 %v1235_v45, %v1247_v56  ;;  %v733_v56 = vld [vmem:[#allocation8] sm:$0xff] }
 0x134   :  { %656 = vmatpush.msrb.mxu1 %v590_v2  ;;  %v639_v2 = vmax.f32 %v571_v47, 0.0  ;;  %v594_v53 = vmax.f32 %v459_v27, 0.0  ;;  %v635_v31 = vmax.f32 %v561_v15, 0.0  ;;  %v629_v37 = vmax.f32 %v546_v16, 0.0 }
 0x135   :  { %v628_v5 = vmax.f32 %v544_v12, 0.0  ;;  %v626_v0 = vmax.f32 %v539_v4, 0.0 }
 0x136   :  { %657 = vmatpush.msrb.mxu1 %v589_v49  ;;  %v638_v49 = vmax.f32 %v569_v19, 0.0 }
 0x138   :  { %658 = vmatpush.msrb.mxu1 %v588_v62  ;;  %v573_v13 = vpop.f32.mrf.mxu3  ;;  %v748_v62 = vld [vmem:[#allocation8 + $0x78] sm:$0xff] }
 0x139   :  { %v460_v33 = vpop.f32.mrf.mxu0  ;;  %v574_v50 = vadd.f32 %v1235_v45, %v573_v13  ;;  %v743_v13 = vld [vmem:[#allocation8 + $0x50] sm:$0xff] }
 0x13a   :  { %659 = vmatpush.msrb.mxu1 %v587_v32  ;;  %v461_v38 = vadd.f32 %v1235_v45, %v460_v33  ;;  %v634_v32 = vmax.f32 %v559_v36, 0.0  ;;  %v633_v33 = vmax.f32 %v556_v28, 0.0 }
 0x13b   :  { %v640_v23 = vmax.f32 %v574_v50, 0.0 }
 0x13c   :  { %660 = vmatpush.msrb.mxu1 %v586_v34  ;;  %v595_v29 = vmax.f32 %v461_v38, 0.0  ;;  %v632_v34 = vmax.f32 %v554_v42, 0.0 }
 0x13e   :  { %661 = vmatpush.msrb.mxu1 %v585_v35  ;;  %v742_v35 = vld [vmem:[#allocation8 + $0x48] sm:$0xff] }
 0x140   :  { %662 = vmatpush.msrb.mxu1 %v584_v44  ;;  %v575_v61 = vpop.f32.mrf.mxu3  ;;  %v741_v44 = vld [vmem:[#allocation8 + $0x40] sm:$0xff] }
 0x141   :  { %v463_v40 = vpop.f32.mrf.mxu0  ;;  %v576_v52 = vadd.f32 %v1235_v45, %v575_v61  ;;  %v735_v61 = vld [vmem:[#allocation8 + $0x10] sm:$0xff] }
 0x142   :  { %663 = vmatpush.msrb.mxu1 %v583_v63  ;;  %v464_v54 = vadd.f32 %v1235_v45, %v463_v40  ;;  %v740_v63 = vld [vmem:[#allocation8 + $0x38] sm:$0xff]  ;;  %v739_v40 = vld [vmem:[#allocation8 + $0x30] sm:$0xff] }
 0x143   :  { %v641_v6 = vmax.f32 %v576_v52, 0.0 }
 0x144   :  { %664 = vmatpush.msrb.mxu1 %v582_v46  ;;  %v596_v41 = vmax.f32 %v464_v54, 0.0  ;;  %v648_v46 = vld.sshfl [vmem:[#allocation1 + $0x18] sm:$0xff pattern:$0x73625140] }
 0x146   :  { %665 = vmatpush.msrb.mxu1 %v581_v59  ;;  %v736_v59 = vld [vmem:[#allocation8 + $0x18] sm:$0xff] }
 0x148   :  { %666 = vmatpush.msrb.mxu1 %v580_v57 }
 0x149   :  { %v465_v10 = vpop.f32.mrf.mxu0 }
 0x14a   :  { %667 = vmatpush.msrb.mxu1 %v579_v55  ;;  %v466_v43 = vadd.f32 %v1235_v45, %v465_v10  ;;  %v734_v45 = vld [vmem:[#allocation8 + $0x8] sm:$0xff] }
 0x14c   :  { %668 = vmatpush.msrb.mxu1 %v578_v14  ;;  %v597_v22 = vmax.f32 %v466_v43, 0.0  ;;  %v1035_v14 = vld [vmem:[%s1413_s5] ss:$0 sm:$0xff] }
 0x14d   :  { %669 = vmatmul.f32.vlgmr.msrb.gmra.mxu1 %v645_v18 }
 0x14e   :  { %713 = vmatpush.msra.mxu1 %v641_v6  ;;  %685 = vmatpush.msrb.mxu2 %v597_v22 }
 0x150   :  { %714 = vmatpush.msra.mxu1 %v640_v23  ;;  %686 = vmatpush.msrb.mxu2 %v596_v41 }
 0x152   :  { %715 = vmatpush.msra.mxu1 %v639_v2  ;;  %687 = vmatpush.msrb.mxu2 %v595_v29 }
 0x154   :  { %716 = vmatpush.msra.mxu1 %v638_v49  ;;  %688 = vmatpush.msrb.mxu2 %v594_v53 }
 0x155   :  { %689 = vmatmul.f32.vlgmr.msrb.gmra.mxu2 %v646_v30 }
 0x156   :  { %717 = vmatpush.msra.mxu1 %v637_v26  ;;  %753 = vmatpush.msra.mxu2 %v748_v62 }
 0x158   :  { %718 = vmatpush.msra.mxu1 %v636_v7  ;;  %754 = vmatpush.msra.mxu2 %v747_v58 }
 0x15a   :  { %719 = vmatpush.msra.mxu1 %v635_v31  ;;  %755 = vmatpush.msra.mxu2 %v746_v21 }
 0x15c   :  { %720 = vmatpush.msra.mxu1 %v634_v32  ;;  %756 = vmatpush.msra.mxu2 %v745_v17 }
 0x15e   :  { %721 = vmatpush.msra.mxu1 %v633_v33  ;;  %757 = vmatpush.msra.mxu2 %v744_v51 }
 0x160   :  { %722 = vmatpush.msra.mxu1 %v632_v34  ;;  %758 = vmatpush.msra.mxu2 %v743_v13 }
 0x162   :  { %723 = vmatpush.msra.mxu1 %v631_v3  ;;  %759 = vmatpush.msra.mxu2 %v742_v35 }
 0x164   :  { %724 = vmatpush.msra.mxu1 %v630_v9  ;;  %760 = vmatpush.msra.mxu2 %v741_v44 }
 0x166   :  { %725 = vmatpush.msra.mxu1 %v629_v37  ;;  %761 = vmatpush.msra.mxu2 %v740_v63 }
 0x168   :  { %726 = vmatpush.msra.mxu1 %v628_v5  ;;  %762 = vmatpush.msra.mxu2 %v739_v40 }
 0x16a   :  { %727 = vmatpush.msra.mxu1 %v627_v39  ;;  %763 = vmatpush.msra.mxu2 %v738_v60 }
 0x16c   :  { %728 = vmatpush.msra.mxu1 %v626_v0  ;;  %764 = vmatpush.msra.mxu2 %v737_v1 }
 0x16d   :  { %729 = vmatmul.f32.vlgmr.msra.gmra.mxu1 %v648_v46 }
 0x16e   :  { %765 = vmatpush.msra.mxu2 %v736_v59 }
 0x170   :  { %766 = vmatpush.msra.mxu2 %v735_v61 }
 0x172   :  { %767 = vmatpush.msra.mxu2 %v734_v45 }
 0x174   :  { %768 = vmatpush.msra.mxu2 %v733_v56 }
 0x1b3   :  { %v710_v55 = vpop.f32.mrf.mxu3 }
 0x1ca   :  { %v670_v48 = vpop.f32.mrf.mxu1 }
 0x1d8   :  { %v690_v57 = vpop.f32.mrf.mxu2 }
 0x1d9   :  { %v691_v52 = vadd.f32 %v690_v57, %v670_v48 }
 0x1db   :  { %v711_v54 = vadd.f32 %v710_v55, %v691_v52 }
 0x1ea   :  { %v730_v50 = vpop.f32.mrf.mxu1 }
 0x1eb   :  { %v731_v10 = vadd.f32 %v730_v50, %v711_v54 }
 0x1ed   :  { %769 = vmatmul.f32.vlgmr.msra.gmra.mxu2 %v731_v10 }
 0x270   :  { %v770_v43 = vpop.f32.mrf.mxu2 }
 0x271   :  { %v771_v47 = vadd.f32 %v1035_v14, %v770_v43 }
 0x273   :  { %v774_v6 = vrot.slane %v771_v47, 1  ;;  %776 = vst [vmem:[#allocation10] sm:$0x1] %v771_v47 }
 0x275   :  { %777 = vst [vmem:[#allocation10 + $0x1] sm:$0x1] %v774_v6 }
 0x276   :  { %790 = dma.vmem_to_hbm [thread:$0]  %s783_s21, 32, %s785_s24, [#allocation4], %s1173_s25, %s1173_s25, %s1174_s26  }
 0x277   :  { %1162 = dma.done.wait [#allocation4], 32  }
 0x278   :  { %1163 = vsyncadd [#allocation4], 4294967264 }
 0x279   :  { %795 = vsyncpa [#allocation3], 1 }
 0x27a   :  { %796 = vsyncpa [#allocation6], 1 }
 0x27b   :  { %797 = vsyncpa [#allocation9], 1 }
 0x27c   :  { %798 = vsyncpa [#allocation4], 1 }

</bundles_post_ra>
